<compile_context>
chip_gen: v7x
topology: tpu7x:2x2x1
jax: 0.10.0
libtpu: 0.0.40
codegen_flags: <defaults>
</compile_context>

<pallas_src>
import functools

import numpy as np

import jax
import jax.numpy as jnp
from jax import lax
from jax.experimental import pallas as pl
from jax.experimental.pallas import tpu as pltpu

# synthetic observer parameters for the QuantStub (deterministic, in-script)
_QSCALE = 0.05
_QINV_SCALE = 1.0 / _QSCALE          # multiply instead of divide in the kernel
_QZERO_POINT = 128.0


def _fake_quant(x):
    # jnp.round is round-half-to-even, matching torch.quantize_per_tensor.
    q = jnp.round(x * _QINV_SCALE) + _QZERO_POINT
    q = jnp.clip(q, 0.0, 255.0)
    return (q - _QZERO_POINT) * _QSCALE


def _quant_conv_relu_kernel(x_ref, w_ref, b_ref, m_ref, o_ref, *, W_img):
    """One block = one-or-more whole images concatenated on the lane axis.

    x_ref: (Cpad, L)      channel-padded input, L = imgs_per_step * H * W  (VMEM)
    w_ref: (Cout, 9*Cpad) conv weight, column k = (kh*3 + kw)*Cpad + ci    (VMEM)
    b_ref: (Cout, 1)      bias                                             (VMEM)
    m_ref: (9, L)         precomputed boundary masks (1.0 valid / 0.0 pad) (VMEM)
    o_ref: (Cout, L)      lane-dense output                                (VMEM)
    """
    L = x_ref.shape[1]

    # ---- QuantStub: fake quant-dequant (per-tensor affine, uint8 range) ----
    xdq = _fake_quant(x_ref[...].astype(jnp.float32))

    # ---- model_fp32: 3x3 conv (pad=1, stride=1) as ONE im2col matmul ----
    # Each tap (dh, dw) is a lane rotation of the flat image(s) times a constant
    # boundary mask.  Cross-image leakage from the roll only hits positions the
    # mask zeroes, so concatenating images on the lane axis is safe.
    taps = []
    t = 0
    for dh in (-1, 0, 1):
        for dw in (-1, 0, 1):
            s = dh * W_img + dw
            rolled = xdq if s == 0 else pltpu.roll(xdq, shift=(-s) % L, axis=1)
            taps.append(rolled * m_ref[t:t + 1, :])      # one broadcast mul per tap
            t += 1

    # Each tap is a full (8, L) sublane tile -> aligned stacking, no relayout.
    patches = jnp.concatenate(taps, axis=0)              # (9*Cpad, L)
    acc = jnp.dot(w_ref[...], patches,
                  preferred_element_type=jnp.float32)    # single MXU push
    acc = jnp.maximum(acc + b_ref[...], 0.0)             # bias + ReLU

    # ---- DeQuantStub: identity in this float emulation ----
    o_ref[...] = acc.astype(o_ref.dtype)


def _grid_steps(n_batch):
    """1 step on single-TC chips (v5e/v6e); 2 parallel steps on dual-TC v7x."""
    kind = ""
    try:
        kind = (jax.devices()[0].device_kind or "").lower()
    except Exception:
        pass
    if "v7" in kind and n_batch % 2 == 0:
        return 2
    return 1


def quant_stub_model(x_nchw, weight_oihw, bias):
    """Forward of quantStubModel.
    x_nchw: (N, Cin, H, W) f32; weight_oihw: (Cout, Cin, 3, 3); bias: (Cout,).
    Returns (N, Cout, H, W) f32 (same NCHW convention as PyTorch)."""
    N, Cin, H, W = x_nchw.shape
    Cout = weight_oihw.shape[0]
    HW = H * W
    Cpad = ((Cin + 7) // 8) * 8                    # one full f32 sublane tile

    steps = _grid_steps(N)
    imgs_per_step = N // steps
    L = imgs_per_step * HW                         # lanes per grid step

    # Channel-pad to a full sublane tile and fold the batch onto the lane axis.
    # (Tiny ~KiB-scale transposes/pads in the wrapper; they enable aligned im2col.)
    x_p = jnp.pad(x_nchw.astype(jnp.float32),
                  ((0, 0), (0, Cpad - Cin), (0, 0), (0, 0)))
    x2 = jnp.transpose(x_p, (1, 0, 2, 3)).reshape(Cpad, N * HW)

    w_p = jnp.pad(weight_oihw.astype(jnp.float32),
                  ((0, 0), (0, Cpad - Cin), (0, 0), (0, 0)))
    # (Cout, Cpad, 3, 3) -> (Cout, (kh, kw, ci)) matching tap-major / ci-minor concat.
    w2 = jnp.transpose(w_p, (0, 2, 3, 1)).reshape(Cout, 9 * Cpad)
    b2 = bias.reshape(Cout, 1).astype(jnp.float32)

    # Trace-time boundary masks: one (HW,) row per tap, tiled over images in a block.
    hh = np.arange(HW) // W
    ww = np.arange(HW) % W
    rows = []
    for dh in (-1, 0, 1):
        for dw in (-1, 0, 1):
            valid = ((hh + dh >= 0) & (hh + dh < H)
                     & (ww + dw >= 0) & (ww + dw < W))
            rows.append(valid.astype(np.float32))
    mask = jnp.asarray(np.tile(np.stack(rows, axis=0), (1, imgs_per_step)))  # (9, L)

    kernel = functools.partial(_quant_conv_relu_kernel, W_img=W)

    out2 = pl.pallas_call(
        kernel,
        out_shape=jax.ShapeDtypeStruct((Cout, N * HW), jnp.float32),
        grid=(steps,),
        in_specs=[
            pl.BlockSpec((Cpad, L), lambda i: (0, i)),
            pl.BlockSpec((Cout, 9 * Cpad), lambda i: (0, 0)),
            pl.BlockSpec((Cout, 1), lambda i: (0, 0)),     # full-array block (see review)
            pl.BlockSpec((9, L), lambda i: (0, 0)),
        ],
        out_specs=pl.BlockSpec((Cout, L), lambda i: (0, i)),
        compiler_params=pltpu.CompilerParams(
            dimension_semantics=("parallel",)),
    )(x2, w2, b2, mask)

    return jnp.transpose(out2.reshape(Cout, N, H, W), (1, 0, 2, 3))


def _reference(x_nchw, weight_oihw, bias):
    """Pure-JAX reference of the same forward (fake-quant -> conv3x3 pad=1 -> ReLU)."""
    xdq = _fake_quant(x_nchw.astype(jnp.float32))
    y = lax.conv_general_dilated(
        xdq, weight_oihw.astype(jnp.float32),
        window_strides=(1, 1), padding=((1, 1), (1, 1)),
        dimension_numbers=("NCHW", "OIHW", "NCHW"))
    return jnp.maximum(y + bias.reshape(1, -1, 1, 1), 0.0)


if __name__ == "__main__":
    key = jax.random.PRNGKey(0)
    kx, kw, kb = jax.random.split(key, 3)

    N, Cin, H, W, Cout = 2, 4, 16, 16, 8
    x = jax.random.normal(kx, (N, Cin, H, W), dtype=jnp.float32)
    # deterministic synthetic parameters for the wrapped fp32 conv
    weight = jax.random.normal(kw, (Cout, Cin, 3, 3), dtype=jnp.float32) * 0.1
    bias = jax.random.normal(kb, (Cout,), dtype=jnp.float32) * 0.1

    out = quant_stub_model(x, weight, bias)
    jax.block_until_ready(out)
    assert out.shape == (N, Cout, H, W)

    # Loose tolerance: covers MXU f32 pass decomposition differences between the
    # Pallas matmul and XLA's conv at default precision; structural bugs would be O(1).
    ref = _reference(x, weight, bias)
    max_err = float(jnp.max(jnp.abs(out - ref)))
    assert max_err < 2e-2, f"mismatch vs reference, max abs err = {max_err}"

    # TODO(synk): model_fp32 is user-supplied in PyTorch; a Conv2d+ReLU body was chosen here.
    print("KERNEL_OK")
</pallas_src>

<mosaic_0001>
module attributes {stable_mosaic.version = 11 : i64} {
  func.func @_quant_conv_relu_kernel(%arg0: i32, %arg1: memref<8x512xf32, #tpu.memory_space<vmem>>, %arg2: memref<8x72xf32, #tpu.memory_space<vmem>>, %arg3: memref<8x1xf32, #tpu.memory_space<vmem>>, %arg4: memref<9x512xf32, #tpu.memory_space<vmem>>, %arg5: memref<8x512xf32, #tpu.memory_space<vmem>>) attributes {dimension_semantics = [#tpu.dimension_semantics<parallel>], iteration_bounds = array<i64: 1>, scalar_prefetch = 0 : i64, scratch_operands = 0 : i64, tpu.core_type = #tpu.core_type<tc>, window_params = [{transform_indices = @transform_0, window_bounds = array<i64: 8, 512>}, {pipeline_mode = #tpu.pipeline_mode<synchronous>, transform_indices = @transform_1, window_bounds = array<i64: 8, 72>}, {pipeline_mode = #tpu.pipeline_mode<synchronous>, transform_indices = @transform_2, window_bounds = array<i64: 8, 1>}, {pipeline_mode = #tpu.pipeline_mode<synchronous>, transform_indices = @transform_3, window_bounds = array<i64: 9, 512>}, {transform_indices = @transform_4, window_bounds = array<i64: 8, 512>}]} {
    %c0 = arith.constant 0 : index
    %c0_0 = arith.constant 0 : index
    %0 = vector.load %arg1[%c0, %c0_0] : memref<8x512xf32, #tpu.memory_space<vmem>>, vector<8x512xf32>
    %cst = arith.constant 2.000000e+01 : f32
    %1 = vector.broadcast %cst : f32 to vector<8x512xf32>
    %2 = arith.mulf %0, %1 : vector<8x512xf32>
    %3 = math.roundeven %2 : vector<8x512xf32>
    %cst_1 = arith.constant 1.280000e+02 : f32
    %4 = vector.broadcast %cst_1 : f32 to vector<8x512xf32>
    %5 = arith.addf %3, %4 : vector<8x512xf32>
    %cst_2 = arith.constant 0.000000e+00 : f32
    %cst_3 = arith.constant 2.550000e+02 : f32
    %6 = vector.broadcast %cst_2 : f32 to vector<8x512xf32>
    %7 = arith.maximumf %6, %5 : vector<8x512xf32>
    %8 = vector.broadcast %cst_3 : f32 to vector<8x512xf32>
    %9 = arith.minimumf %8, %7 : vector<8x512xf32>
    %cst_4 = arith.constant 1.280000e+02 : f32
    %10 = vector.broadcast %cst_4 : f32 to vector<8x512xf32>
    %11 = arith.subf %9, %10 : vector<8x512xf32>
    %cst_5 = arith.constant 5.000000e-02 : f32
    %12 = vector.broadcast %cst_5 : f32 to vector<8x512xf32>
    %13 = arith.mulf %11, %12 : vector<8x512xf32>
    %c17_i32 = arith.constant 17 : i32
    %14 = tpu.dynamic_rotate %13 by %c17_i32 dim 1 : vector<8x512xf32>, i32 -> vector<8x512xf32>
    %c0_6 = arith.constant 0 : index
    %c0_7 = arith.constant 0 : index
    %15 = vector.load %arg4[%c0_6, %c0_7] : memref<9x512xf32, #tpu.memory_space<vmem>>, vector<1x512xf32>
    %16 = vector.broadcast %15 : vector<1x512xf32> to vector<8x512xf32>
    %17 = arith.mulf %14, %16 : vector<8x512xf32>
    %c16_i32 = arith.constant 16 : i32
    %18 = tpu.dynamic_rotate %13 by %c16_i32 dim 1 : vector<8x512xf32>, i32 -> vector<8x512xf32>
    %c1 = arith.constant 1 : index
    %c0_8 = arith.constant 0 : index
    %19 = vector.load %arg4[%c1, %c0_8] : memref<9x512xf32, #tpu.memory_space<vmem>>, vector<1x512xf32>
    %20 = vector.broadcast %19 : vector<1x512xf32> to vector<8x512xf32>
    %21 = arith.mulf %18, %20 : vector<8x512xf32>
    %c15_i32 = arith.constant 15 : i32
    %22 = tpu.dynamic_rotate %13 by %c15_i32 dim 1 : vector<8x512xf32>, i32 -> vector<8x512xf32>
    %c2 = arith.constant 2 : index
    %c0_9 = arith.constant 0 : index
    %23 = vector.load %arg4[%c2, %c0_9] : memref<9x512xf32, #tpu.memory_space<vmem>>, vector<1x512xf32>
    %24 = vector.broadcast %23 : vector<1x512xf32> to vector<8x512xf32>
    %25 = arith.mulf %22, %24 : vector<8x512xf32>
    %c1_i32 = arith.constant 1 : i32
    %26 = tpu.dynamic_rotate %13 by %c1_i32 dim 1 : vector<8x512xf32>, i32 -> vector<8x512xf32>
    %c3 = arith.constant 3 : index
    %c0_10 = arith.constant 0 : index
    %27 = vector.load %arg4[%c3, %c0_10] : memref<9x512xf32, #tpu.memory_space<vmem>>, vector<1x512xf32>
    %28 = vector.broadcast %27 : vector<1x512xf32> to vector<8x512xf32>
    %29 = arith.mulf %26, %28 : vector<8x512xf32>
    %c4 = arith.constant 4 : index
    %c0_11 = arith.constant 0 : index
    %30 = vector.load %arg4[%c4, %c0_11] : memref<9x512xf32, #tpu.memory_space<vmem>>, vector<1x512xf32>
    %31 = vector.broadcast %30 : vector<1x512xf32> to vector<8x512xf32>
    %32 = arith.mulf %13, %31 : vector<8x512xf32>
    %c511_i32 = arith.constant 511 : i32
    %33 = tpu.dynamic_rotate %13 by %c511_i32 dim 1 : vector<8x512xf32>, i32 -> vector<8x512xf32>
    %c5 = arith.constant 5 : index
    %c0_12 = arith.constant 0 : index
    %34 = vector.load %arg4[%c5, %c0_12] : memref<9x512xf32, #tpu.memory_space<vmem>>, vector<1x512xf32>
    %35 = vector.broadcast %34 : vector<1x512xf32> to vector<8x512xf32>
    %36 = arith.mulf %33, %35 : vector<8x512xf32>
    %c497_i32 = arith.constant 497 : i32
    %37 = tpu.dynamic_rotate %13 by %c497_i32 dim 1 : vector<8x512xf32>, i32 -> vector<8x512xf32>
    %c6 = arith.constant 6 : index
    %c0_13 = arith.constant 0 : index
    %38 = vector.load %arg4[%c6, %c0_13] : memref<9x512xf32, #tpu.memory_space<vmem>>, vector<1x512xf32>
    %39 = vector.broadcast %38 : vector<1x512xf32> to vector<8x512xf32>
    %40 = arith.mulf %37, %39 : vector<8x512xf32>
    %c496_i32 = arith.constant 496 : i32
    %41 = tpu.dynamic_rotate %13 by %c496_i32 dim 1 : vector<8x512xf32>, i32 -> vector<8x512xf32>
    %c7 = arith.constant 7 : index
    %c0_14 = arith.constant 0 : index
    %42 = vector.load %arg4[%c7, %c0_14] : memref<9x512xf32, #tpu.memory_space<vmem>>, vector<1x512xf32>
    %43 = vector.broadcast %42 : vector<1x512xf32> to vector<8x512xf32>
    %44 = arith.mulf %41, %43 : vector<8x512xf32>
    %c495_i32 = arith.constant 495 : i32
    %45 = tpu.dynamic_rotate %13 by %c495_i32 dim 1 : vector<8x512xf32>, i32 -> vector<8x512xf32>
    %c8 = arith.constant 8 : index
    %c0_15 = arith.constant 0 : index
    %46 = vector.load %arg4[%c8, %c0_15] : memref<9x512xf32, #tpu.memory_space<vmem>>, vector<1x512xf32>
    %47 = vector.broadcast %46 : vector<1x512xf32> to vector<8x512xf32>
    %48 = arith.mulf %45, %47 : vector<8x512xf32>
    %49 = tpu.concatenate %17, %21, %25, %29, %32, %36, %40, %44, %48 in 0 : vector<8x512xf32>, vector<8x512xf32>, vector<8x512xf32>, vector<8x512xf32>, vector<8x512xf32>, vector<8x512xf32>, vector<8x512xf32>, vector<8x512xf32>, vector<8x512xf32> -> vector<72x512xf32>
    %c0_16 = arith.constant 0 : index
    %c0_17 = arith.constant 0 : index
    %50 = vector.load %arg2[%c0_16, %c0_17] : memref<8x72xf32, #tpu.memory_space<vmem>>, vector<8x72xf32>
    %cst_18 = arith.constant dense<0.000000e+00> : vector<8x512xf32>
    %51 = tpu.matmul %50, %49, %cst_18 {dimension_numbers = #tpu.dot_dimension_numbers<[1], [0], [0], [1], [0, 0, 1, 1], [], []>} : vector<8x72xf32>, vector<72x512xf32>, vector<8x512xf32> -> vector<8x512xf32>
    %c0_19 = arith.constant 0 : index
    %c0_20 = arith.constant 0 : index
    %52 = vector.load %arg3[%c0_19, %c0_20] : memref<8x1xf32, #tpu.memory_space<vmem>>, vector<8x1xf32>
    %53 = vector.broadcast %52 : vector<8x1xf32> to vector<8x512xf32>
    %54 = arith.addf %51, %53 : vector<8x512xf32>
    %cst_21 = arith.constant 0.000000e+00 : f32
    %55 = vector.broadcast %cst_21 : f32 to vector<8x512xf32>
    %56 = arith.maximumf %54, %55 : vector<8x512xf32>
    %c0_22 = arith.constant 0 : index
    %c0_23 = arith.constant 0 : index
    %57 = vector.load %arg5[%c0_22, %c0_23] : memref<8x512xf32, #tpu.memory_space<vmem>>, vector<8x512xf32>
    tpu.vector_store %arg5[%c0_22, %c0_23], %56 {strides = array<i32>} : memref<8x512xf32, #tpu.memory_space<vmem>>, vector<8x512xf32>,
    return
  }
  func.func @transform_0(%arg0: i32) -> (i32, i32) {
    %c0_i32 = arith.constant 0 : i32
    %c0_i32_0 = arith.constant 0 : i32
    return %c0_i32, %arg0 : i32, i32
  }
  func.func @transform_1(%arg0: i32) -> (i32, i32) {
    %c0_i32 = arith.constant 0 : i32
    %c0_i32_0 = arith.constant 0 : i32
    %c0_i32_1 = arith.constant 0 : i32
    return %c0_i32, %c0_i32_0 : i32, i32
  }
  func.func @transform_2(%arg0: i32) -> (i32, i32) {
    %c0_i32 = arith.constant 0 : i32
    %c0_i32_0 = arith.constant 0 : i32
    %c0_i32_1 = arith.constant 0 : i32
    return %c0_i32, %c0_i32_0 : i32, i32
  }
  func.func @transform_3(%arg0: i32) -> (i32, i32) {
    %c0_i32 = arith.constant 0 : i32
    %c0_i32_0 = arith.constant 0 : i32
    %c0_i32_1 = arith.constant 0 : i32
    return %c0_i32, %c0_i32_0 : i32, i32
  }
  func.func @transform_4(%arg0: i32) -> (i32, i32) {
    %c0_i32 = arith.constant 0 : i32
    %c0_i32_0 = arith.constant 0 : i32
    return %c0_i32, %arg0 : i32, i32
  }
}

</mosaic_0001>

<bundles_post_ra>
// kernel: tpu_custom_call.1
= control target key start
LH: loop header
LB: loop body
LE: loop exit
PB: predicated region body
PF: predicated region fallthrough
CT: control target
= control target key end

     0   :  { %9 = vsyncpa [#allocation3], 0  ;;  %s966_s0 = inlined_call_operand.hbm [shape: f32[8,512], index: 0, kind: input, shape index: {}]   ;;  %s967_s1 = inlined_call_operand.vmem [shape: f32[8,72], index: 1, kind: input, shape index: {}]   ;;  %s968_s2 = inlined_call_operand.vmem [shape: f32[8,1], index: 2, kind: input, shape index: {}]   ;;  %s969_s3 = inlined_call_operand.hbm [shape: f32[9,512], index: 3, kind: input, shape index: {}]   ;;  %s970_s4 = inlined_call_operand.hbm [shape: f32[8,512], index: 4, kind: output, shape index: {}]  }
   0x1   :  { %10 = vsyncpa [#allocation6], 0 }
   0x2   :  { %11 = vsyncpa [#allocation4], 0  ;;  %s731_s15 = smov [#allocation2]   ;;  %s732_s17 = smov [#allocation5]  }
   0x3   :  { %s18_s16 = sshll.u32 %s731_s15, 4  ;;  %s31_s18 = sshll.u32 %s732_s17, 4  ;;  %s19_s16 = int_to_ptr.vmem [resolvable:$true] %s18_s16  ;;  %s771_s18 = int_to_ptr.vmem [resolvable:$true] %s31_s18 }
   0x4   :  { %s659_s21 = scalar_lea.hbm %s966_s0, 512 }
   0x5   :  { %p660_p0 = scmp.ne.s32.totalorder %s966_s0, %s659_s21  ;;  %p663_p1 = scmp.lt.u32.totalorder %s659_s21, %s966_s0 }
   0x7   :  { %p665_p2 = pnand %p663_p1, %p660_p0 }
   0x9   :  { %668 = shalt.err (!%p665_p2)
}
   0xa   :  { %s669_s26 = scalar_lea.vmem %s19_s16, 512  ;;  %p674_p4 = scmp.lt.s32.totalorder %s19_s16, %s19_s16 }
   0xb   :  { %p670_p3 = scmp.ne.s32.totalorder %s19_s16, %s669_s26  ;;  %p675_p5 = scmp.lt.s32.totalorder %s669_s26, %s669_s26 }
   0xd   :  { %p676_p6 = por %p675_p5, %p674_p4 }
   0xf   :  { %p677_p7 = pnand %p676_p6, %p670_p3 }
  0x11   :  { %680 = shalt.err (!%p677_p7)
}
  0x12   :  { %21 = dma.hbm_to_vmem [thread:$0]  %s966_s0, 512, %s19_s16, [#allocation3]  }
  0x13   :  { %s681_s5 = scalar_lea.hbm %s969_s3, 1024 }
  0x14   :  { %p682_p8 = scmp.ne.s32.totalorder %s969_s3, %s681_s5  ;;  %p685_p9 = scmp.lt.u32.totalorder %s681_s5, %s969_s3 }
  0x16   :  { %p687_p10 = pnand %p685_p9, %p682_p8 }
  0x18   :  { %690 = shalt.err (!%p687_p10)
}
  0x19   :  { %s691_s10 = scalar_lea.vmem %s771_s18, 1024  ;;  %p696_p12 = scmp.lt.s32.totalorder %s771_s18, %s771_s18 }
  0x1a   :  { %p692_p11 = scmp.ne.s32.totalorder %s771_s18, %s691_s10  ;;  %p697_p13 = scmp.lt.s32.totalorder %s691_s10, %s691_s10 }
  0x1c   :  { %p698_p0 = por %p697_p13, %p696_p12 }
  0x1e   :  { %p699_p1 = pnand %p698_p0, %p692_p11 }
  0x20   :  { %702 = shalt.err (!%p699_p1)
}
  0x21   :  { %s733_s0 = smov 512   ;;  %s734_s11 = smov 32  }
  0x22   :  { %37 = dma.hbm_to_vmem [thread:$0]  %s969_s3, 1024, %s771_s18, [#allocation6], %s733_s0, %s733_s0, %s734_s11  }
  0x23   :  { %725 = dma.done.wait [#allocation3], 512  }
  0x24   :  { %726 = vsyncadd [#allocation3], 4294966784 }
  0x25   :  { %727 = dma.done.wait [#allocation6], 1024  }
  0x26   :  { %728 = vsyncadd [#allocation6], 4294966272  ;;  %v46_v0 = vld [vmem:[#allocation2 + $0x10] sm:$0xff]  ;;  %v44_v1 = vld [vmem:[#allocation2] sm:$0xff]  ;;  %s735_s3 = smov 17   ;;  %s736_s14 = smov 16   ;;  %v84_v35 = vlaneseq }
  0x27   :  { %v47_v2 = vld [vmem:[#allocation2 + $0x18] sm:$0xff]  ;;  %v50_v3 = vmul.f32 20.0, %v46_v0  ;;  %v48_v4 = vmul.f32 20.0, %v44_v1  ;;  %v45_v6 = vld [vmem:[#allocation2 + $0x8] sm:$0xff]  ;;  %s737_s15 = smov 15   ;;  %s738_s16 = smov 1  }
  0x28   :  { %v51_v5 = vmul.f32 20.0, %v47_v2  ;;  %v49_v7 = vmul.f32 20.0, %v45_v6  ;;  %s739_s17 = smov 127   ;;  %s740_s18 = smov 113   ;;  %v742_v32 = vmov 0.0   ;;  %v743_v33 = vmov 0  }
  0x29   :  { %v641_v8 = vround.rtne.f32 %v50_v3  ;;  %v639_v9 = vround.rtne.f32 %v48_v4  ;;  %s741_s19 = smov 112   ;;  %499 = vmatprep.mubr.f32.mxu0 %v742_v32  ;;  %570 = vmatprep.mubr.f32.mxu1 %v742_v32  ;;  %s744_s20 = smov 111   ;;  %v425_v34 = vld [vmem:[%s968_s2] sm:$0xff]  ;;  %v94_v36 = vshrl.u32 %v84_v35, 7  ;;  %v845_v39 = vand.u32 127, %v84_v35 }
  0x2a   :  { %v642_v10 = vround.rtne.f32 %v51_v5  ;;  %v640_v11 = vround.rtne.f32 %v49_v7  ;;  %658 = vset.pattern.permute.xlu0 %v743_v33  ;;  %v91_v41 = vld [vmem:[#allocation5] ss:$8 sm:$0xf]  ;;  %v131_v42 = vld [vmem:[#allocation5 + $0x1] ss:$8 sm:$0xf] }
  0x2b   :  { %v58_v12 = vadd.f32 128.0, %v641_v8  ;;  %v56_v13 = vadd.f32 128.0, %v639_v9  ;;  %v847_v40 = vsub.s32 1, %v94_v36  ;;  %vm86_vm0 = vcmp.lt.s32.totalorder %v845_v39, 17  ;;  %s745_s24 = smov [#allocation7]  }
  0x2c   :  { %v59_v14 = vadd.f32 128.0, %v642_v10  ;;  %v57_v15 = vadd.f32 128.0, %v640_v11  ;;  %v850_v43 = vsub.s32 0, %v94_v36  ;;  %v852_v45 = vsub.s32 2, %v94_v36  ;;  %s591_s25 = sshll.u32 %s745_s24, 4  ;;  %s592_s25 = int_to_ptr.vmem [resolvable:$true] %s591_s25 }
  0x2d   :  { %v62_v16 = vmax.f32 %v58_v12, 0.0  ;;  %v60_v17 = vmax.f32 %v56_v13, 0.0  ;;  %v854_v47 = vsub.s32 3, %v94_v36  ;;  %vm125_vm1 = vcmp.lt.s32.totalorder %v845_v39, 16  ;;  %p708_p3 = scmp.lt.s32.totalorder %s592_s25, %s592_s25 }
  0x2e   :  { %v63_v18 = vmax.f32 %v59_v14, 0.0  ;;  %v61_v19 = vmax.f32 %v57_v15, 0.0  ;;  %v100_v48 = vrot.slane %v91_v41, %v847_v40  ;;  %v140_v49 = vrot.slane %v131_v42, %v847_v40 }
  0x2f   :  { %v66_v20 = vmin.f32 %v62_v16, 255.0  ;;  %v64_v21 = vmin.f32 %v60_v17, 255.0  ;;  %v96_v51 = vrot.slane %v91_v41, %v850_v43  ;;  %v104_v52 = vrot.slane %v91_v41, %v852_v45 }
  0x30   :  { %v67_v22 = vmin.f32 %v63_v18, 255.0  ;;  %v65_v23 = vmin.f32 %v61_v19, 255.0  ;;  %v108_v55 = vrot.slane %v91_v41, %v854_v47  ;;  %v136_v58 = vrot.slane %v131_v42, %v850_v43  ;;  %v171_v18 = vld [vmem:[#allocation5 + $0x2] ss:$8 sm:$0xf] }
  0x31   :  { %v603_v24 = vadd.f32 -128.0, %v66_v20  ;;  %v601_v25 = vadd.f32 -128.0, %v64_v21  ;;  %v144_v59 = vrot.slane %v131_v42, %v852_v45  ;;  %v148_v63 = vrot.slane %v131_v42, %v854_v47  ;;  %v211_v19 = vld [vmem:[#allocation5 + $0x3] ss:$8 sm:$0xf] }
  0x32   :  { %v604_v26 = vadd.f32 -128.0, %v67_v22  ;;  %v602_v27 = vadd.f32 -128.0, %v65_v23  ;;  %vm165_vm2 = vcmp.lt.s32.totalorder %v845_v39, 15  ;;  %v180_v22 = vrot.slane %v171_v18, %v847_v40 }
  0x33   :  { %v802_v28 = vmul.f32 0.05, %v603_v24  ;;  %v804_v29 = vmul.f32 0.05, %v601_v25  ;;  %vm205_vm3 = vcmp.lt.s32.totalorder %v845_v39, 1  ;;  %v220_v23 = vrot.slane %v211_v19, %v847_v40 }
  0x34   :  { %v808_v30 = vmul.f32 0.05, %v604_v26  ;;  %v810_v31 = vmul.f32 0.05, %v602_v27  ;;  %v176_v25 = vrot.slane %v171_v18, %v850_v43  ;;  %v184_v26 = vrot.slane %v171_v18, %v852_v45 }
  0x35   :  { %80 = vrot.lane.b32.xlu1 %v802_v28, %s735_s3  ;;  %76 = vrot.lane.b32.xlu0 %v804_v29, %s735_s3  ;;  %v188_v27 = vrot.slane %v171_v18, %v854_v47  ;;  %v216_v36 = vrot.slane %v211_v19, %v850_v43  ;;  %vm272_vm4 = vcmp.lt.s32.totalorder %v845_v39, 127  ;;  %vm352_vm5 = vcmp.lt.s32.totalorder %v845_v39, 112 }
  0x36   :  { %vm312_vm6 = vcmp.lt.s32.totalorder %v845_v39, 113  ;;  %vm392_vm7 = vcmp.lt.s32.totalorder %v845_v39, 111  ;;  %vm431_vm8 = vcmask 588800  }
  0x39   :  { %82 = vrot.lane.b32.xlu1 %v808_v30, %s735_s3  ;;  %78 = vrot.lane.b32.xlu0 %v810_v31, %s735_s3 }
  0x3d   :  { %119 = vrot.lane.b32.xlu1 %v810_v31, %s736_s14  ;;  %117 = vrot.lane.b32.xlu0 %v804_v29, %s736_s14 }
  0x41   :  { %123 = vrot.lane.b32.xlu1 %v808_v30, %s736_s14  ;;  %121 = vrot.lane.b32.xlu0 %v802_v28, %s736_s14 }
  0x45   :  { %159 = vrot.lane.b32.xlu1 %v810_v31, %s737_s15  ;;  %157 = vrot.lane.b32.xlu0 %v804_v29, %s737_s15 }
  0x49   :  { %163 = vrot.lane.b32.xlu1 %v808_v30, %s737_s15  ;;  %161 = vrot.lane.b32.xlu0 %v802_v28, %s737_s15 }
  0x4d   :  { %199 = vrot.lane.b32.xlu1 %v810_v31, %s738_s16  ;;  %197 = vrot.lane.b32.xlu0 %v804_v29, %s738_s16 }
  0x51   :  { %203 = vrot.lane.b32.xlu1 %v808_v30, %s738_s16  ;;  %201 = vrot.lane.b32.xlu0 %v802_v28, %s738_s16 }
  0x55   :  { %266 = vrot.lane.b32.xlu1 %v810_v31, %s739_s17  ;;  %264 = vrot.lane.b32.xlu0 %v804_v29, %s739_s17 }
  0x59   :  { %270 = vrot.lane.b32.xlu1 %v808_v30, %s739_s17  ;;  %268 = vrot.lane.b32.xlu0 %v802_v28, %s739_s17 }
  0x5d   :  { %306 = vrot.lane.b32.xlu1 %v810_v31, %s740_s18  ;;  %304 = vrot.lane.b32.xlu0 %v804_v29, %s740_s18 }
  0x61   :  { %310 = vrot.lane.b32.xlu1 %v808_v30, %s740_s18  ;;  %308 = vrot.lane.b32.xlu0 %v802_v28, %s740_s18 }
  0x65   :  { %346 = vrot.lane.b32.xlu1 %v810_v31, %s741_s19  ;;  %344 = vrot.lane.b32.xlu0 %v804_v29, %s741_s19 }
  0x69   :  { %350 = vrot.lane.b32.xlu1 %v808_v30, %s741_s19  ;;  %348 = vrot.lane.b32.xlu0 %v802_v28, %s741_s19 }
  0x6d   :  { %386 = vrot.lane.b32.xlu1 %v810_v31, %s744_s20  ;;  %384 = vrot.lane.b32.xlu0 %v804_v29, %s744_s20 }
  0x71   :  { %390 = vrot.lane.b32.xlu1 %v808_v30, %s744_s20  ;;  %388 = vrot.lane.b32.xlu0 %v802_v28, %s744_s20 }
  0x75   :  { %428 = vperm.xlu0 %658, %v425_v34  }
  0xa7   :  { %v81_v37 = vpop.permute.xlu1 %80  ;;  %v77_v38 = vpop.permute.xlu0 %76 }
  0xab   :  { %v83_v44 = vpop.permute.xlu1 %82  ;;  %v79_v46 = vpop.permute.xlu0 %78 }
  0xac   :  { %v89_v50 = vsel %vm86_vm0, %v77_v38, %v79_v46  ;;  %v90_v56 = vsel %vm86_vm0, %v83_v44, %v77_v38  ;;  %v88_v60 = vsel %vm86_vm0, %v79_v46, %v81_v37  ;;  %v87_v0 = vsel %vm86_vm0, %v81_v37, %v83_v44 }
  0xad   :  { %v114_v61 = vmul.f32 %v100_v48, %v89_v50  ;;  %v113_v1 = vmul.f32 %v96_v51, %v90_v56  ;;  %v115_v5 = vmul.f32 %v104_v52, %v88_v60  ;;  %v116_v11 = vmul.f32 %v108_v55, %v87_v0  ;;  %v238_v52 = vld [vmem:[#allocation5 + $0x4] ss:$8 sm:$0xf] }
  0xae   :  { %v224_v37 = vrot.slane %v211_v19, %v852_v45  ;;  %v228_v44 = vrot.slane %v211_v19, %v854_v47  ;;  %v243_v0 = vrot.slane %v238_v52, %v850_v43 }
  0xaf   :  { %v120_v53 = vpop.permute.xlu1 %119  ;;  %v118_v54 = vpop.permute.xlu0 %117 }
  0xb0   :  { %v128_v57 = vsel %vm125_vm1, %v118_v54, %v120_v53 }
  0xb1   :  { %v154_v62 = vmul.f32 %v140_v49, %v128_v57 }
  0xb3   :  { %v124_v2 = vpop.permute.xlu1 %123  ;;  %v122_v3 = vpop.permute.xlu0 %121  ;;  %v607_v4 = vpack.c.bf16 %v154_v62, %v114_v61  ;;  %v278_v61 = vld [vmem:[#allocation5 + $0x5] ss:$8 sm:$0xf]  ;;  %v247_v62 = vrot.slane %v238_v52, %v847_v40 }
  0xb4   :  { %v129_v6 = vsel %vm125_vm1, %v124_v2, %v118_v54  ;;  %v126_v7 = vsel %vm125_vm1, %v122_v3, %v124_v2  ;;  %v127_v8 = vsel %vm125_vm1, %v120_v53, %v122_v3 }
  0xb5   :  { %v153_v9 = vmul.f32 %v136_v58, %v129_v6  ;;  %v155_v10 = vmul.f32 %v144_v59, %v127_v8  ;;  %608 = vmatprep.subr.bf16.mxu0 %v607_v4  ;;  %v156_v12 = vmul.f32 %v148_v63, %v126_v7  ;;  %v255_v63 = vrot.slane %v238_v52, %v854_v47 }
  0xb6   :  { %v251_v6 = vrot.slane %v238_v52, %v852_v45  ;;  %v283_v7 = vrot.slane %v278_v61, %v850_v43  ;;  %v295_v8 = vrot.slane %v278_v61, %v854_v47 }
  0xb7   :  { %v160_v13 = vpop.permute.xlu1 %159  ;;  %v158_v14 = vpop.permute.xlu0 %157  ;;  %v609_v15 = vpack.c.bf16 %v153_v9, %v113_v1  ;;  %v623_v16 = vpack.c.bf16 %v156_v12, %v116_v11  ;;  %v625_v17 = vpack.c.bf16 %v155_v10, %v115_v5  ;;  %v287_v10 = vrot.slane %v278_v61, %v847_v40 }
  0xb8   :  { %v168_v24 = vsel %vm165_vm2, %v158_v14, %v160_v13  ;;  %v291_v11 = vrot.slane %v278_v61, %v852_v45 }
  0xb9   :  { %610 = vmatpush1.bf16.msra.mxu0 %v609_v15  ;;  %624 = vmatprep.subr.bf16.mxu1 %v623_v16  ;;  %v194_v38 = vmul.f32 %v180_v22, %v168_v24  ;;  %v263_v15 = vmul.f32 %v255_v63, %v808_v30  ;;  %v260_v16 = vmul.f32 %v243_v0, %v804_v29 }
  0xba   :  { %626 = vmatpush1.bf16.msra.mxu1 %v625_v17  ;;  %v262_v17 = vmul.f32 %v251_v6, %v802_v28 }
  0xbb   :  { %v164_v20 = vpop.permute.xlu1 %163  ;;  %v162_v21 = vpop.permute.xlu0 %161 }
  0xbc   :  { %v169_v34 = vsel %vm165_vm2, %v164_v20, %v158_v14  ;;  %v167_v41 = vsel %vm165_vm2, %v160_v13, %v162_v21  ;;  %v166_v46 = vsel %vm165_vm2, %v162_v21, %v164_v20  ;;  %v261_v14 = vmul.f32 %v247_v62, %v810_v31 }
  0xbd   :  { %v193_v48 = vmul.f32 %v176_v25, %v169_v34  ;;  %v195_v53 = vmul.f32 %v184_v26, %v167_v41  ;;  %v196_v57 = vmul.f32 %v188_v27, %v166_v46  ;;  %v318_v34 = vld [vmem:[#allocation5 + $0x6] ss:$8 sm:$0xf] }
  0xbe   :  { %v323_v52 = vrot.slane %v318_v34, %v850_v43 }
  0xbf   :  { %v200_v32 = vpop.permute.xlu1 %199  ;;  %v198_v33 = vpop.permute.xlu0 %197 }
  0xc0   :  { %v208_v35 = vsel %vm205_vm3, %v198_v33, %v200_v32 }
  0xc1   :  { %v234_v42 = vmul.f32 %v220_v23, %v208_v35  ;;  %v335_v35 = vrot.slane %v318_v34, %v854_v47 }
  0xc3   :  { %v204_v49 = vpop.permute.xlu1 %203  ;;  %v202_v50 = vpop.permute.xlu0 %201  ;;  %v611_v51 = vpack.c.bf16 %v234_v42, %v194_v38  ;;  %v331_v42 = vrot.slane %v318_v34, %v852_v45 }
  0xc4   :  { %v209_v54 = vsel %vm205_vm3, %v204_v49, %v198_v33  ;;  %v206_v55 = vsel %vm205_vm3, %v202_v50, %v204_v49  ;;  %v207_v56 = vsel %vm205_vm3, %v200_v32, %v202_v50  ;;  %v358_v33 = vld [vmem:[#allocation5 + $0x7] ss:$8 sm:$0xf] }
  0xc5   :  { %v233_v58 = vmul.f32 %v216_v36, %v209_v54  ;;  %v235_v59 = vmul.f32 %v224_v37, %v207_v56  ;;  %v236_v60 = vmul.f32 %v228_v44, %v206_v55  ;;  %612 = vmatprep.subr.bf16.mxu0 %v611_v51  ;;  %v327_v36 = vrot.slane %v318_v34, %v847_v40 }
  0xc6   :  { %v363_v46 = vrot.slane %v358_v33, %v850_v43  ;;  %v375_v49 = vrot.slane %v358_v33, %v854_v47  ;;  %v367_v50 = vrot.slane %v358_v33, %v847_v40  ;;  %v371_v51 = vrot.slane %v358_v33, %v852_v45 }
  0xc7   :  { %v267_v1 = vpop.permute.xlu1 %266  ;;  %v265_v2 = vpop.permute.xlu0 %264  ;;  %v613_v3 = vpack.c.bf16 %v233_v58, %v193_v48  ;;  %v627_v4 = vpack.c.bf16 %v236_v60, %v196_v57  ;;  %v629_v5 = vpack.c.bf16 %v235_v59, %v195_v53 }
  0xc8   :  { %v275_v9 = vsel %vm272_vm4, %v265_v2, %v267_v1 }
  0xc9   :  { %614 = vmatpush1.bf16.msra.mxu0 %v613_v3  ;;  %628 = vmatprep.subr.bf16.mxu1 %v627_v4  ;;  %v300_v18 = vmul.f32 %v283_v7, %v275_v9 }
  0xca   :  { %630 = vmatpush1.bf16.msra.mxu1 %v629_v5  ;;  %v398_v5 = vld [vmem:[#allocation5 + $0x20] ss:$8 sm:$0xf] }
  0xcb   :  { %v271_v12 = vpop.permute.xlu1 %270  ;;  %v269_v13 = vpop.permute.xlu0 %268  ;;  %v617_v27 = vpack.c.bf16 %v300_v18, %v260_v16 }
  0xcc   :  { %v276_v19 = vsel %vm272_vm4, %v271_v12, %v265_v2  ;;  %v273_v20 = vsel %vm272_vm4, %v269_v13, %v271_v12  ;;  %v274_v21 = vsel %vm272_vm4, %v267_v1, %v269_v13  ;;  %v407_v12 = vrot.slane %v398_v5, %v847_v40  ;;  %v424_v40 = vld [vmem:[%s967_s1] sm:$0xff]  ;;  %s703_s1 = scalar_lea.vmem %s592_s25, 512 }
  0xcd   :  { %v303_v22 = vmul.f32 %v295_v8, %v276_v19  ;;  %v301_v23 = vmul.f32 %v287_v10, %v274_v21  ;;  %v302_v24 = vmul.f32 %v291_v11, %v273_v20  ;;  %v415_v11 = vrot.slane %v398_v5, %v854_v47  ;;  %p704_p2 = scmp.ne.s32.totalorder %s592_s25, %s703_s1  ;;  %p709_p4 = scmp.lt.s32.totalorder %s703_s1, %s703_s1 }
  0xce   :  { %v411_v13 = vrot.slane %v398_v5, %v852_v45 }
  0xcf   :  { %v307_v31 = vpop.permute.xlu1 %306  ;;  %v305_v25 = vpop.permute.xlu0 %304  ;;  %v615_v30 = vpack.c.bf16 %v301_v23, %v261_v14  ;;  %v631_v26 = vpack.c.bf16 %v303_v22, %v263_v15  ;;  %v633_v29 = vpack.c.bf16 %v302_v24, %v262_v17  ;;  %v403_v14 = vrot.slane %v398_v5, %v850_v43  ;;  %p710_p5 = por %p709_p4, %p708_p3 }
  0xd0   :  { %v315_v54 = vsel %vm312_vm6, %v305_v25, %v307_v31 }
  0xd1   :  { %616 = vmatprep.subr.bf16.mxu0 %v615_v30  ;;  %632 = vmatprep.subr.bf16.mxu1 %v631_v26  ;;  %v340_v3 = vmul.f32 %v323_v52, %v315_v54  ;;  %p711_p6 = pnand %p710_p5, %p704_p2 }
  0xd2   :  { %618 = vmatpush1.bf16.msra.mxu0 %v617_v27  ;;  %634 = vmatpush1.bf16.msra.mxu1 %v633_v29 }
  0xd3   :  { %v311_v28 = vpop.permute.xlu1 %310  ;;  %v309_v32 = vpop.permute.xlu0 %308 }
  0xd4   :  { %v316_v41 = vsel %vm312_vm6, %v311_v28, %v305_v25  ;;  %v314_v44 = vsel %vm312_vm6, %v307_v31, %v309_v32  ;;  %v313_v53 = vsel %vm312_vm6, %v309_v32, %v311_v28 }
  0xd5   :  { %v343_v55 = vmul.f32 %v335_v35, %v316_v41  ;;  %v341_v56 = vmul.f32 %v327_v36, %v314_v44  ;;  %v342_v63 = vmul.f32 %v331_v42, %v313_v53 }
  0xd7   :  { %v347_v37 = vpop.permute.xlu1 %346  ;;  %v345_v38 = vpop.permute.xlu0 %344 }
  0xd8   :  { %v355_v48 = vsel %vm352_vm5, %v345_v38, %v347_v37 }
  0xd9   :  { %v380_v59 = vmul.f32 %v363_v46, %v355_v48 }
  0xdb   :  { %v351_v57 = vpop.permute.xlu1 %350  ;;  %v349_v58 = vpop.permute.xlu0 %348  ;;  %v621_v10 = vpack.c.bf16 %v380_v59, %v340_v3 }
  0xdc   :  { %v356_v60 = vsel %vm352_vm5, %v351_v57, %v345_v38  ;;  %v353_v61 = vsel %vm352_vm5, %v349_v58, %v351_v57  ;;  %v354_v62 = vsel %vm352_vm5, %v347_v37, %v349_v58 }
  0xdd   :  { %v383_v0 = vmul.f32 %v375_v49, %v356_v60  ;;  %v381_v1 = vmul.f32 %v367_v50, %v354_v62  ;;  %v382_v2 = vmul.f32 %v371_v51, %v353_v61 }
  0xdf   :  { %v387_v4 = vpop.permute.xlu1 %386  ;;  %v385_v6 = vpop.permute.xlu0 %384  ;;  %v619_v7 = vpack.c.bf16 %v381_v1, %v341_v56  ;;  %v635_v8 = vpack.c.bf16 %v383_v0, %v343_v55  ;;  %v637_v9 = vpack.c.bf16 %v382_v2, %v342_v63 }
  0xe0   :  { %v395_v15 = vsel %vm392_vm7, %v385_v6, %v387_v4 }
  0xe1   :  { %620 = vmatprep.subr.bf16.mxu0 %v619_v7  ;;  %636 = vmatprep.subr.bf16.mxu1 %v635_v8  ;;  %v420_v23 = vmul.f32 %v403_v14, %v395_v15 }
  0xe2   :  { %622 = vmatpush1.bf16.msra.mxu0 %v621_v10  ;;  %638 = vmatpush1.bf16.msra.mxu1 %v637_v9 }
  0xe3   :  { %v391_v16 = vpop.permute.xlu1 %390  ;;  %v389_v17 = vpop.permute.xlu0 %388 }
  0xe4   :  { %v396_v18 = vsel %vm392_vm7, %v391_v16, %v385_v6  ;;  %v393_v19 = vsel %vm392_vm7, %v389_v17, %v391_v16  ;;  %v394_v20 = vsel %vm392_vm7, %v387_v4, %v389_v17 }
  0xe5   :  { %v423_v39 = vmul.f32 %v415_v11, %v396_v18  ;;  %v421_v21 = vmul.f32 %v407_v12, %v394_v20  ;;  %v422_v22 = vmul.f32 %v411_v13, %v393_v19 }
  0xe7   :  { %451 = vmatprep.subr.mxu0 %v421_v21  ;;  %522 = vmatprep.subr.mxu1 %v423_v39 }
  0xe8   :  { %452 = vmatpush1.msra.mxu0 %v420_v23  ;;  %523 = vmatpush1.msra.mxu1 %v422_v22 }
  0xe9   :  { %605 = vmatmul.mubr.msk.f32.vlgmr.msra.gmra.mrb[0].mxu0 %vm431_vm8, %v424_v40  ;;  %606 = vmatmul.mubr.msk.f32.vlgmr.msra.gmra.mrb[0].mxu1 %vm431_vm8, %v424_v40 }
  0xf4   :  { %v429_v43 = vpop.permute.xlu0 %428 }
 0x1bc   :  { %v572_v45 = vpop.f32.mrb[0].mxu1  ;;  %v501_v47 = vpop.f32.mrb[0].mxu0 }
 0x1bd   :  { %v573_v24 = vadd.f32 %v572_v45, %v429_v43  ;;  %v502_v31 = vadd.f32 %v501_v47, %v429_v43  ;;  %v503_v25 = vpop.f32.mrb[1].mxu0  ;;  %v574_v30 = vpop.f32.mrb[1].mxu1 }
 0x1be   :  { %v504_v26 = vadd.f32 %v503_v25, %v429_v43  ;;  %v575_v29 = vadd.f32 %v574_v30, %v429_v43 }
 0x1bf   :  { %v579_v27 = vmax.f32 %v573_v24, 0.0  ;;  %v577_v28 = vmax.f32 %v502_v31, 0.0 }
 0x1c0   :  { %v578_v32 = vmax.f32 %v504_v26, 0.0  ;;  %v580_v33 = vmax.f32 %v575_v29, 0.0 }
 0x1c1   :  { %583 = vst [vmem:[#allocation7 + $0x10] sm:$0xff] %v579_v27  ;;  %581 = vst [vmem:[#allocation7] sm:$0xff] %v577_v28 }
 0x1c2   :  { %582 = vst [vmem:[#allocation7 + $0x8] sm:$0xff] %v578_v32  ;;  %584 = vst [vmem:[#allocation7 + $0x18] sm:$0xff] %v580_v33 }
 0x1c3   :  { %714 = shalt.err (!%p711_p6)
}
 0x1c4   :  { %s715_s28 = scalar_lea.hbm %s970_s4, 512 }
 0x1c5   :  { %p716_p7 = scmp.ne.s32.totalorder %s970_s4, %s715_s28  ;;  %p719_p8 = scmp.lt.u32.totalorder %s715_s28, %s970_s4 }
 0x1c7   :  { %p721_p9 = pnand %p719_p8, %p716_p7 }
 0x1c9   :  { %724 = shalt.err (!%p721_p9)
}
 0x1ca   :  { %594 = dma.vmem_to_hbm [thread:$0]  %s592_s25, 512, %s970_s4, [#allocation4]  }
 0x1cb   :  { %729 = dma.done.wait [#allocation4], 512  }
 0x1cc   :  { %730 = vsyncadd [#allocation4], 4294966784 }
 0x1cd   :  { %598 = vsyncpa [#allocation3], 1 }
 0x1ce   :  { %599 = vsyncpa [#allocation6], 1 }
 0x1cf   :  { %600 = vsyncpa [#allocation4], 1 }

</bundles_post_ra>
